<compile_context>
chip_gen: v7x
topology: tpu7x:2x2x1
jax: 0.10.0
libtpu: 0.0.40
codegen_flags: <defaults>
</compile_context>

<pallas_src>
import jax
import jax.numpy as jnp
from jax.experimental import pallas as pl
from jax.experimental.pallas import tpu as pltpu


def _pick_tile(total, target):
    """Largest divisor of `total` that is <= target."""
    t = min(target, total)
    while total % t != 0:
        t -= 1
    return t


def classifier_head_kernel(h_ref, w_ref, b_ref, logit_ref, prob_ref, acc_ref):
    # h_ref:   (TB, TS, H) tile of last_hidden_state (f32 or bf16)
    # w_ref:   (1, H) lane-dense Linear weight, pre-scaled by 1/S (VMEM)
    # b_ref:   (1, 1) Linear bias (SMEM)
    # acc_ref: (TB, 1) f32 accumulator, persistent across the S (reduction) axis
    s = pl.program_id(1)

    @pl.when(s == 0)
    def _():
        acc_ref[...] = jnp.zeros_like(acc_ref)

    h = h_ref[...].astype(jnp.float32)              # (TB, TS, H) upcast per tile
    w = w_ref[...].astype(jnp.float32)              # (1, H) == weight / S
    # VPU multiply + XLU reduce; mean(dim=1) and Linear(768, 1) are fused into
    # a single weighted sum (no MXU, no (TB, 768) intermediate accumulator).
    partial = jnp.sum(h * w, axis=2)                # (TB, TS)
    acc_ref[...] += jnp.sum(partial, axis=1, keepdims=True)  # (TB, 1)

    @pl.when(s == pl.num_programs(1) - 1)
    def _():
        logits = acc_ref[...] + b_ref[0, 0]
        logit_ref[...] = logits.astype(logit_ref.dtype)
        prob_ref[...] = jax.nn.sigmoid(logits).astype(prob_ref.dtype)


def classifier_head(hidden_states, weight, bias, *, tb=8, ts=256):
    """Classifier head: logits = Linear(768,1)(mean_S(h)); probs = sigmoid(logits).

    hidden_states: (B, S, H) float32 or bfloat16 last_hidden_state
    weight:        (1, H)   torch-style nn.Linear(768, 1) weight
    bias:          scalar / (1,) / (1, 1) bias
    """
    B, S, H = hidden_states.shape
    tb = _pick_tile(B, tb)
    ts = _pick_tile(S, ts)
    # block last-two dims are (ts, H): ts must be a multiple of 8 or the full S
    if ts != S and ts % 8 != 0:
        ts = S

    # Fold the 1/S mean scale into the weight; keep everything f32.
    w_scaled = weight.reshape(1, H).astype(jnp.float32) / jnp.float32(S)
    b2 = jnp.asarray(bias, jnp.float32).reshape(1, 1)

    grid = (B // tb, S // ts)
    itemsize = hidden_states.dtype.itemsize
    tile_bytes = tb * ts * H * itemsize
    # double-buffered hidden tile + weight + headroom; capped for v7x (64 MiB)
    vmem_bytes = int(min(64 * 1024 * 1024,
                         max(4 * tile_bytes + (1 << 20), 16 * 1024 * 1024)))

    cost = pl.CostEstimate(
        flops=2 * B * S * H,
        transcendentals=B,                     # one sigmoid per row
        bytes_accessed=B * S * H * itemsize + H * 4 + 2 * B * 4,
    )

    out_shape = (
        jax.ShapeDtypeStruct((B, 1), jnp.float32),   # logits
        jax.ShapeDtypeStruct((B, 1), jnp.float32),   # sigmoid(logits)
    )

    return pl.pallas_call(
        classifier_head_kernel,
        out_shape=out_shape,
        grid_spec=pltpu.PrefetchScalarGridSpec(
            num_scalar_prefetch=0,
            grid=grid,
            in_specs=[
                pl.BlockSpec((tb, ts, H), lambda b, s: (b, s, 0)),
                pl.BlockSpec((1, H), lambda b, s: (0, 0)),        # grid-invariant
                pl.BlockSpec((1, 1), lambda b, s: (0, 0),
                             memory_space=pltpu.MemorySpace.SMEM),
            ],
            out_specs=(
                pl.BlockSpec((tb, 1), lambda b, s: (b, 0)),
                pl.BlockSpec((tb, 1), lambda b, s: (b, 0)),
            ),
            scratch_shapes=[pltpu.VMEM((tb, 1), jnp.float32)],
        ),
        compiler_params=pltpu.CompilerParams(
            dimension_semantics=("parallel", "arbitrary"),
            vmem_limit_bytes=vmem_bytes,
        ),
        cost_estimate=cost,
    )(hidden_states, w_scaled, b2)


def reference(hidden_states, weight, bias):
    m = jnp.mean(hidden_states.astype(jnp.float32), axis=1)           # (B, H)
    logits = m @ weight.reshape(-1, 1).astype(jnp.float32) + jnp.float32(bias)
    return logits, jax.nn.sigmoid(logits)


if __name__ == "__main__":
    H = 768  # hidden size fixed at 768 by the module (nn.Linear(768, 1))

    key = jax.random.PRNGKey(0)
    k_h, k_w, k_b, k_h2 = jax.random.split(key, 4)

    # nn.Linear(768, 1) deterministic init (uniform +/- 1/sqrt(H), like torch)
    bound = 1.0 / jnp.sqrt(jnp.float32(H))
    weight = jax.random.uniform(k_w, (1, H), jnp.float32, -bound, bound)
    bias = jax.random.uniform(k_b, (1, 1), jnp.float32, -bound, bound)

    # --- small f32 case (matches the module's tiny-test shapes) ---------------
    B, S = 2, 8
    hidden_states = jax.random.normal(k_h, (B, S, H), dtype=jnp.float32)

    logits, probs = classifier_head(hidden_states, weight, bias)
    jax.block_until_ready((logits, probs))

    ref_logits, ref_probs = reference(hidden_states, weight, bias)
    assert logits.shape == (B, 1) and probs.shape == (B, 1)
    assert jnp.allclose(logits, ref_logits, atol=1e-4, rtol=1e-4)
    assert jnp.allclose(probs, ref_probs, atol=1e-4, rtol=1e-4)

    # --- larger bf16 case: exercises the (B-tile, S-tile) grid + accumulator --
    B2, S2 = 8, 512
    hidden_bf16 = jax.random.normal(k_h2, (B2, S2, H), dtype=jnp.float32
                                    ).astype(jnp.bfloat16)

    logits2, probs2 = classifier_head(hidden_bf16, weight, bias)
    jax.block_until_ready((logits2, probs2))

    ref_logits2, ref_probs2 = reference(hidden_bf16, weight, bias)
    assert logits2.shape == (B2, 1) and probs2.shape == (B2, 1)
    assert jnp.allclose(logits2, ref_logits2, atol=1e-3, rtol=1e-3)
    assert jnp.allclose(probs2, ref_probs2, atol=1e-3, rtol=1e-3)

    print("KERNEL_OK")
</pallas_src>

<mosaic_0001>
module attributes {stable_mosaic.version = 11 : i64} {
  func.func @classifier_head_kernel(%arg0: i32, %arg1: i32, %arg2: memref<2x8x768xf32, #tpu.memory_space<vmem>>, %arg3: memref<1x768xf32, #tpu.memory_space<vmem>>, %arg4: memref<1x1xf32, #tpu.memory_space<smem>>, %arg5: memref<2x1xf32, #tpu.memory_space<vmem>>, %arg6: memref<2x1xf32, #tpu.memory_space<vmem>>, %arg7: memref<2x1xf32, #tpu.memory_space<vmem>>) attributes {dimension_semantics = [#tpu.dimension_semantics<parallel>, #tpu.dimension_semantics<arbitrary>], iteration_bounds = array<i64: 1, 1>, scalar_prefetch = 0 : i64, scratch_operands = 1 : i64, tpu.core_type = #tpu.core_type<tc>, window_params = [{transform_indices = @transform_0, window_bounds = array<i64: 2, 8, 768>}, {pipeline_mode = #tpu.pipeline_mode<synchronous>, transform_indices = @transform_1, window_bounds = array<i64: 1, 768>}, {transform_indices = @transform_2, window_bounds = array<i64: 1, 1>}, {transform_indices = @transform_3, window_bounds = array<i64: 2, 1>}, {transform_indices = @transform_4, window_bounds = array<i64: 2, 1>}]} {
    %c0_i32 = arith.constant 0 : i32
    %0 = arith.cmpi eq, %arg1, %c0_i32 : i32
    %1 = arith.extui %0 : i1 to i32
    %c0_i32_0 = arith.constant 0 : i32
    %2 = arith.cmpi ne, %1, %c0_i32_0 : i32
    scf.if %2 {
      %cst_12 = arith.constant 0.000000e+00 : f32
      %17 = vector.broadcast %cst_12 : f32 to vector<2x1xf32>
      %c0_13 = arith.constant 0 : index
      %c0_14 = arith.constant 0 : index
      %18 = vector.load %arg7[%c0_13, %c0_14] : memref<2x1xf32, #tpu.memory_space<vmem>>, vector<2x1xf32>
      tpu.vector_store %arg7[%c0_13, %c0_14], %17 {strides = array<i32>} : memref<2x1xf32, #tpu.memory_space<vmem>>, vector<2x1xf32>,
    } else {
    }
    %c0 = arith.constant 0 : index
    %c0_1 = arith.constant 0 : index
    %c0_2 = arith.constant 0 : index
    %3 = vector.load %arg2[%c0, %c0_1, %c0_2] : memref<2x8x768xf32, #tpu.memory_space<vmem>>, vector<2x8x768xf32>
    %c0_3 = arith.constant 0 : index
    %c0_4 = arith.constant 0 : index
    %4 = vector.load %arg3[%c0_3, %c0_4] : memref<1x768xf32, #tpu.memory_space<vmem>>, vector<1x768xf32>
    %5 = vector.shape_cast %4 : vector<1x768xf32> to vector<1x1x768xf32>
    %6 = vector.broadcast %5 : vector<1x1x768xf32> to vector<2x8x768xf32>
    %7 = arith.mulf %3, %6 : vector<2x8x768xf32>
    %cst = arith.constant dense<0.000000e+00> : vector<2x8xf32>
    %8 = vector.multi_reduction <add>, %7, %cst [2] : vector<2x8x768xf32> to vector<2x8xf32>
    %c0_5 = arith.constant 0 : index
    %c0_6 = arith.constant 0 : index
    %9 = vector.load %arg7[%c0_5, %c0_6] : memref<2x1xf32, #tpu.memory_space<vmem>>, vector<2x1xf32>
    %cst_7 = arith.constant dense<0.000000e+00> : vector<2xf32>
    %10 = vector.multi_reduction <add>, %8, %cst_7 [1] : vector<2x8xf32> to vector<2xf32>
    %11 = vector.shape_cast %10 : vector<2xf32> to vector<2x1xf32>
    %12 = arith.addf %9, %11 : vector<2x1xf32>
    %c0_8 = arith.constant 0 : index
    %c0_9 = arith.constant 0 : index
    %13 = vector.load %arg7[%c0_8, %c0_9] : memref<2x1xf32, #tpu.memory_space<vmem>>, vector<2x1xf32>
    tpu.vector_store %arg7[%c0_8, %c0_9], %12 {strides = array<i32>} : memref<2x1xf32, #tpu.memory_space<vmem>>, vector<2x1xf32>,
    %c0_i32_10 = arith.constant 0 : i32
    %14 = arith.cmpi eq, %arg1, %c0_i32_10 : i32
    %15 = arith.extui %14 : i1 to i32
    %c0_i32_11 = arith.constant 0 : i32
    %16 = arith.cmpi ne, %15, %c0_i32_11 : i32
    scf.if %16 {
      %c0_12 = arith.constant 0 : index
      %c0_13 = arith.constant 0 : index
      %17 = vector.load %arg7[%c0_12, %c0_13] : memref<2x1xf32, #tpu.memory_space<vmem>>, vector<2x1xf32>
      %c0_14 = arith.constant 0 : index
      %c0_15 = arith.constant 0 : index
      %18 = memref.load %arg4[%c0_14, %c0_15] : memref<1x1xf32, #tpu.memory_space<smem>>
      %19 = vector.broadcast %18 : f32 to vector<2x1xf32>
      %20 = arith.addf %17, %19 : vector<2x1xf32>
      %c0_16 = arith.constant 0 : index
      %c0_17 = arith.constant 0 : index
      %21 = vector.load %arg5[%c0_16, %c0_17] : memref<2x1xf32, #tpu.memory_space<vmem>>, vector<2x1xf32>
      tpu.vector_store %arg5[%c0_16, %c0_17], %20 {strides = array<i32>} : memref<2x1xf32, #tpu.memory_space<vmem>>, vector<2x1xf32>,
      %22 = arith.negf %20 : vector<2x1xf32>
      %23 = math.exp %22 : vector<2x1xf32>
      %cst_18 = arith.constant 1.000000e+00 : f32
      %24 = vector.broadcast %cst_18 : f32 to vector<2x1xf32>
      %25 = arith.addf %24, %23 : vector<2x1xf32>
      %26 = arith.divf %24, %25 : vector<2x1xf32>
      %c0_19 = arith.constant 0 : index
      %c0_20 = arith.constant 0 : index
      %27 = vector.load %arg6[%c0_19, %c0_20] : memref<2x1xf32, #tpu.memory_space<vmem>>, vector<2x1xf32>
      tpu.vector_store %arg6[%c0_19, %c0_20], %26 {strides = array<i32>} : memref<2x1xf32, #tpu.memory_space<vmem>>, vector<2x1xf32>,
    } else {
    }
    return
  }
  func.func @transform_0(%arg0: i32, %arg1: i32) -> (i32, i32, i32) {
    %c0_i32 = arith.constant 0 : i32
    %c0_i32_0 = arith.constant 0 : i32
    return %arg0, %arg1, %c0_i32 : i32, i32, i32
  }
  func.func @transform_1(%arg0: i32, %arg1: i32) -> (i32, i32) {
    %c0_i32 = arith.constant 0 : i32
    %c0_i32_0 = arith.constant 0 : i32
    %c0_i32_1 = arith.constant 0 : i32
    return %c0_i32, %c0_i32_0 : i32, i32
  }
  func.func @transform_2(%arg0: i32, %arg1: i32) -> (i32, i32) {
    %c0_i32 = arith.constant 0 : i32
    %c0_i32_0 = arith.constant 0 : i32
    %c0_i32_1 = arith.constant 0 : i32
    return %c0_i32, %c0_i32_0 : i32, i32
  }
  func.func @transform_3(%arg0: i32, %arg1: i32) -> (i32, i32) {
    %c0_i32 = arith.constant 0 : i32
    %c0_i32_0 = arith.constant 0 : i32
    return %arg0, %c0_i32 : i32, i32
  }
  func.func @transform_4(%arg0: i32, %arg1: i32) -> (i32, i32) {
    %c0_i32 = arith.constant 0 : i32
    %c0_i32_0 = arith.constant 0 : i32
    return %arg0, %c0_i32 : i32, i32
  }
}

</mosaic_0001>

<bundles_post_ra>
// kernel: tpu_custom_call.1
= control target key start
LH: loop header
LB: loop body
LE: loop exit
PB: predicated region body
PF: predicated region fallthrough
CT: control target
= control target key end

     0   :  { %11 = vsyncpa [#allocation5], 0  ;;  %s187_s15 = smov [#allocation4]   ;;  %s244_s0 = inlined_call_operand.hbm [shape: f32[2,8,768], index: 0, kind: input, shape index: {}]   ;;  %s245_s1 = inlined_call_operand.vmem [shape: f32[1,768], index: 1, kind: input, shape index: {}]   ;;  %s246_s2 = inlined_call_operand.<no memory space> [shape: f32[1,1], index: 2, kind: input, shape index: {}]   ;;  %s247_s3 = inlined_call_operand.vmem [shape: f32[2,1], index: 3, kind: output, shape index: {0}]   ;;  %s248_s4 = inlined_call_operand.vmem [shape: f32[2,1], index: 4, kind: output, shape index: {1}]  }
   0x1   :  { %s17_s16 = sshll.u32 %s187_s15, 4  ;;  %s163_s19 = scalar_lea.hbm %s244_s0, 1536  ;;  %s18_s16 = int_to_ptr.vmem [resolvable:$true] %s17_s16 }
   0x2   :  { %p164_p0 = scmp.ne.s32.totalorder %s244_s0, %s163_s19  ;;  %p167_p1 = scmp.lt.u32.totalorder %s163_s19, %s244_s0 }
   0x4   :  { %p169_p2 = pnand %p167_p1, %p164_p0 }
   0x6   :  { %172 = shalt.err (!%p169_p2)
}
   0x7   :  { %s173_s24 = scalar_lea.vmem %s18_s16, 1536  ;;  %p178_p4 = scmp.lt.s32.totalorder %s18_s16, %s18_s16 }
   0x8   :  { %p174_p3 = scmp.ne.s32.totalorder %s18_s16, %s173_s24  ;;  %p179_p5 = scmp.lt.s32.totalorder %s173_s24, %s173_s24 }
   0xa   :  { %p180_p6 = por %p179_p5, %p178_p4 }
   0xc   :  { %p181_p7 = pnand %p180_p6, %p174_p3 }
   0xe   :  { %184 = shalt.err (!%p181_p7)
}
   0xf   :  { %s188_s25 = smov 768   ;;  %s189_s26 = smov 48  }
  0x10   :  { %23 = dma.hbm_to_vmem [thread:$0]  %s244_s0, 1536, %s18_s16, [#allocation5], %s188_s25, %s188_s25, %s189_s26  }
  0x11   :  { %185 = dma.done.wait [#allocation5], 1536  }
  0x12   :  { %186 = vsyncadd [#allocation5], 4294965760  ;;  %v51_v0 = vlaneseq  ;;  %v37_v8 = vld [vmem:[#allocation4] sm:$0xff]  ;;  %v38_v10 = vld [vmem:[#allocation4 + $0x8] sm:$0xff]  ;;  %vm35_vm0 = vcmask 1024   ;;  %v190_v51 = vmov 0.0   ;;  %v135_v61 = vstv %s246_s2 }
  0x13   :  { %v39_v11 = vld [vmem:[#allocation4 + $0x10] sm:$0xff]  ;;  %v49_v12 = vld [vmem:[%s245_s1] sm:$0x3f]  ;;  %v46_v26 = vld [vmem:[#allocation4 + $0x48] sm:$0xff]  ;;  %36 = vst.msk [vmem:[#allocation2] sm:$0x3] %vm35_vm0, %v190_v51 }
  0x14   :  { %v52_v1 = vshrl.u32 %v51_v0, 7  ;;  %v111_v2 = vand.u32 127, %v51_v0  ;;  %v43_v18 = vld [vmem:[#allocation4 + $0x30] sm:$0xff]  ;;  %v44_v19 = vld [vmem:[#allocation4 + $0x38] sm:$0xff]  ;;  %v45_v21 = vld [vmem:[#allocation4 + $0x40] sm:$0xff]  ;;  %vm120_vm1 = vcmask 1041409  }
  0x15   :  { %v40_v20 = vld [vmem:[#allocation4 + $0x18] sm:$0xff]  ;;  %v41_v27 = vld [vmem:[#allocation4 + $0x20] sm:$0xff]  ;;  %v47_v33 = vld [vmem:[#allocation4 + $0x50] sm:$0xff]  ;;  %vm123_vm2 = vcmask 58368  }
  0x16   :  { %v114_v3 = vsub.s32 %v111_v2, %v52_v1  ;;  %v53_v4 = vsub.s32 0, %v52_v1  ;;  %v57_v5 = vsub.s32 1, %v52_v1  ;;  %v61_v6 = vsub.s32 2, %v52_v1  ;;  %v42_v35 = vld [vmem:[#allocation4 + $0x28] sm:$0xff]  ;;  %v48_v40 = vld [vmem:[#allocation4 + $0x58] sm:$0xff] }
  0x17   :  { %v65_v7 = vsub.s32 3, %v52_v1  ;;  %v69_v9 = vsub.s32 4, %v52_v1  ;;  %v73_v13 = vsub.s32 5, %v52_v1 }
  0x18   :  { %v54_v14 = vrot.slane %v49_v12, %v53_v4  ;;  %v58_v15 = vrot.slane %v49_v12, %v57_v5  ;;  %v62_v16 = vrot.slane %v49_v12, %v61_v6 }
  0x19   :  { %v66_v17 = vrot.slane %v49_v12, %v65_v7  ;;  %v70_v22 = vrot.slane %v49_v12, %v69_v9  ;;  %v74_v30 = vrot.slane %v49_v12, %v73_v13 }
  0x1a   :  { %v81_v23 = vmul.f32 %v54_v14, %v37_v8  ;;  %v82_v24 = vmul.f32 %v58_v15, %v38_v10  ;;  %v83_v25 = vmul.f32 %v62_v16, %v39_v11  ;;  %v87_v28 = vmul.f32 %v54_v14, %v43_v18  ;;  %v107_v58 = vld [vmem:[#allocation2] sm:$0x3] }
  0x1b   :  { %v88_v29 = vmul.f32 %v58_v15, %v44_v19  ;;  %v84_v31 = vmul.f32 %v66_v17, %v40_v20  ;;  %v89_v34 = vmul.f32 %v62_v16, %v45_v21  ;;  %v90_v36 = vmul.f32 %v66_v17, %v46_v26 }
  0x1c   :  { %v93_v32 = vadd.f32 %v82_v24, %v81_v23  ;;  %v85_v38 = vmul.f32 %v70_v22, %v41_v27  ;;  %v91_v41 = vmul.f32 %v70_v22, %v47_v33  ;;  %v86_v43 = vmul.f32 %v74_v30, %v42_v35 }
  0x1d   :  { %v100_v37 = vadd.f32 %v88_v29, %v87_v28  ;;  %v92_v47 = vmul.f32 %v74_v30, %v48_v40 }
  0x1e   :  { %v94_v39 = vadd.f32 %v93_v32, %v83_v25 }
  0x1f   :  { %v101_v42 = vadd.f32 %v100_v37, %v89_v34 }
  0x20   :  { %v95_v44 = vadd.f32 %v94_v39, %v84_v31 }
  0x21   :  { %v102_v45 = vadd.f32 %v101_v42, %v90_v36 }
  0x22   :  { %v96_v46 = vadd.f32 %v95_v44, %v85_v38 }
  0x23   :  { %v103_v48 = vadd.f32 %v102_v45, %v91_v41 }
  0x24   :  { %v97_v49 = vadd.f32 %v96_v46, %v86_v43 }
  0x25   :  { %v104_v50 = vadd.f32 %v103_v48, %v92_v47 }
  0x26   :  { %98 = vadd.xlane.f32.xlu0 %v97_v49 }
  0x2a   :  { %105 = vadd.xlane.f32.xlu0 %v104_v50 }
  0xb3   :  { %v99_v52 = vpop.xlane.xlu0 %98 }
  0xb4   :  { %v115_v54 = vrot.slane %v99_v52, %v114_v3 }
  0xb7   :  { %v106_v53 = vpop.xlane.xlu0 %105 }
  0xb8   :  { %v119_v55 = vrot.slane %v106_v53, %v114_v3 }
  0xba   :  { %v121_v56 = vsel %vm120_vm1, %v119_v55, %v115_v54 }
  0xbb   :  { %v124_v57 = vsel %vm123_vm2, %v121_v56, 0.0 }
  0xbc   :  { %125 = vadd.xlane.f32.xlu1 %v124_v57 }
 0x149   :  { %v126_v59 = vpop.xlane.xlu1 %125 }
 0x14a   :  { %v127_v60 = vadd.f32 %v126_v59, %v107_v58 }
 0x14c   :  { %129 = vst.msk [vmem:[#allocation2] sm:$0x3] %vm35_vm0, %v127_v60 }
 0x153   :  { %v133_v62 = vld [vmem:[#allocation2] sm:$0x3] }
 0x154   :  { %v136_v63 = vadd.f32 %v135_v61, %v133_v62 }
 0x156   :  { %137 = vst.msk [vmem:[%s247_s3] sm:$0x3] %vm35_vm0, %v136_v63  ;;  %v154_v0 = vmul.f32 -1.442695, %v136_v63 }
 0x158   :  { %159 = vpow2.f32 %v154_v0 }
 0x162   :  { %v160_v1 = vpop.eup %159 }
 0x163   :  { %v141_v2 = vadd.f32 1.0, %v160_v1 }
 0x165   :  { %161 = vrcp.f32 %v141_v2 }
 0x16f   :  { %v162_v3 = vpop.eup %161 }
 0x170   :  { %144 = vst.msk [vmem:[%s248_s4] sm:$0x3] %vm35_vm0, %v162_v3 }
 0x171   :  { %153 = vsyncpa [#allocation5], 1 }

</bundles_post_ra>
